<compile_context>
chip_gen: v5e
topology: v5e:2x2
jax: 0.10.0
libtpu: 0.0.40
codegen_flags: <defaults>
</compile_context>

<pallas_src>
import functools

import jax
import jax.numpy as jnp
from jax.experimental import pallas as pl
from jax.experimental.pallas import tpu as pltpu  # noqa: F401  (TPU backend)


def _round_up(x, m):
    return (x + m - 1) // m * m


# ---------------------------------------------------------------------------
# Pallas kernel: all GraphConv layers fused, H resident on-chip
# ---------------------------------------------------------------------------
def gcn_fused_kernel(a_ref, h_ref, w_ref, b_ref, o_ref, *, layer_specs):
    """layer_specs: static tuple of (f_in, f_out, apply_relu) per layer."""
    a = a_ref[...]                      # (Np, Np)  bf16 normalized adjacency
    h = h_ref[...]                      # (Np, Fp)  bf16 node features
    out = None
    for i, (f_in, f_out, apply_relu) in enumerate(layer_specs):
        w = w_ref[i]                    # (Fp, Fp)  bf16, zero-padded weight
        b = b_ref[i]                    # (1,  Fp)  f32,  zero-padded bias
        if f_out <= f_in:
            # layer narrows: transform first, aggregate second  A @ (H @ W)
            hw = jnp.dot(h, w, preferred_element_type=jnp.float32)
            out = jnp.dot(a, hw.astype(jnp.bfloat16),
                          preferred_element_type=jnp.float32)
        else:
            # layer widens: aggregate first, transform second  (A @ H) @ W
            ah = jnp.dot(a, h, preferred_element_type=jnp.float32)
            out = jnp.dot(ah.astype(jnp.bfloat16), w,
                          preferred_element_type=jnp.float32)
        out = out + b                   # bias add on f32 accumulator (VPU)
        if apply_relu:
            out = jnp.maximum(out, 0.0)
        h = out.astype(jnp.bfloat16)    # bf16 operand for the next layer
    o_ref[...] = out.astype(o_ref.dtype)


def gcn_forward(a_hat, features, params):
    """Fused multi-layer GraphConv forward. Returns (N, n_classes) f32."""
    # TODO(synk): nn.Dropout is identity in eval mode; training-mode dropout omitted.
    n = a_hat.shape[0]
    f_in0 = features.shape[1]
    dims = [f_in0] + [w.shape[1] for (w, _) in params]
    n_classes = dims[-1]
    num_layers = len(params)

    n_pad = _round_up(n, 128)                       # lane-dense adjacency
    f_pad = max(_round_up(d, 128) for d in dims)    # lane-dense features/output

    # zero-pad + bf16-cast operands (zero padding keeps results exact)
    a_p = jnp.zeros((n_pad, n_pad), jnp.bfloat16).at[:n, :n].set(
        a_hat.astype(jnp.bfloat16))
    h_p = jnp.zeros((n_pad, f_pad), jnp.bfloat16).at[:n, :f_in0].set(
        features.astype(jnp.bfloat16))

    w_stack = jnp.zeros((num_layers, f_pad, f_pad), jnp.bfloat16)
    b_stack = jnp.zeros((num_layers, 1, f_pad), jnp.float32)
    layer_specs = []
    for i, (w, b) in enumerate(params):
        fi, fo = w.shape
        w_stack = w_stack.at[i, :fi, :fo].set(w.astype(jnp.bfloat16))
        b_stack = b_stack.at[i, :, :fo].set(b.astype(jnp.float32))
        layer_specs.append((fi, fo, i < num_layers - 1))   # ReLU except last layer
    layer_specs = tuple(layer_specs)

    kernel = functools.partial(gcn_fused_kernel, layer_specs=layer_specs)
    out_p = pl.pallas_call(
        kernel,
        out_shape=jax.ShapeDtypeStruct((n_pad, f_pad), jnp.float32),
        in_specs=[
            pl.BlockSpec((n_pad, n_pad), lambda: (0, 0)),
            pl.BlockSpec((n_pad, f_pad), lambda: (0, 0)),
            pl.BlockSpec((num_layers, f_pad, f_pad), lambda: (0, 0, 0)),
            pl.BlockSpec((num_layers, 1, f_pad), lambda: (0, 0, 0)),
        ],
        out_specs=pl.BlockSpec((n_pad, f_pad), lambda: (0, 0)),
    )(a_p, h_p, w_stack, b_stack)
    # TODO(synk): for graphs where the dense (N,N) adjacency no longer fits VMEM,
    # replace whole-array blocks with a row/column-tiled grid (reduction axis
    # last, "arbitrary"; parallel row axis to use v7x's 2nd TensorCore).
    return out_p[:n, :n_classes]


# ---------------------------------------------------------------------------
# Model glue: parameter init + adjacency normalization + pure-JAX reference
# ---------------------------------------------------------------------------
def xavier_uniform(key, shape):
    fan_in, fan_out = shape
    limit = jnp.sqrt(6.0 / (fan_in + fan_out))
    return jax.random.uniform(key, shape, jnp.float32, -limit, limit)


def init_gcn_params(key, in_feats, n_hidden, n_classes, n_layers):
    """Matches GCN.__init__: GraphConv(in,h) + (n_layers-1)*GraphConv(h,h) + GraphConv(h,cls)."""
    dims = [in_feats] + [n_hidden] * n_layers + [n_classes]
    params = []
    for i in range(len(dims) - 1):
        key, wk = jax.random.split(key)
        w = xavier_uniform(wk, (dims[i], dims[i + 1]))   # GraphConv weight (xavier)
        b = jnp.zeros((1, dims[i + 1]), jnp.float32)     # GraphConv bias (zeros)
        params.append((w, b))
    return params


def normalize_adjacency(adj):
    """Symmetric normalization D^{-1/2} A D^{-1/2} (DGL norm='both')."""
    deg = jnp.sum(adj, axis=1)
    inv_sqrt = jnp.where(deg > 0, 1.0 / jnp.sqrt(deg), 0.0)
    return adj * inv_sqrt[:, None] * inv_sqrt[None, :]


def gcn_reference(a_hat, features, params):
    """Pure-JAX f32 reference of the same forward pass."""
    h = features
    for i, (w, b) in enumerate(params):
        h = a_hat @ h @ w + b
        if i < len(params) - 1:
            h = jnp.maximum(h, 0.0)
    return h


# ---------------------------------------------------------------------------
# Main
# ---------------------------------------------------------------------------
if __name__ == "__main__":
    key = jax.random.PRNGKey(0)

    # Small problem: 64 nodes, 16 input feats, 32 hidden, 8 classes, n_layers=1
    # (=> 2 GraphConv layers total, matching the module structure).
    N, IN_FEATS, N_HIDDEN, N_CLASSES, N_LAYERS = 64, 16, 32, 8, 1

    key, kg, kf, kp = jax.random.split(key, 4)

    # Random symmetric graph with self-loops (dense adjacency).
    logits = jax.random.uniform(kg, (N, N))
    adj = (logits + logits.T > 1.6).astype(jnp.float32)
    adj = jnp.maximum(adj, jnp.eye(N, dtype=jnp.float32))   # self-loops -> no zero-degree nodes
    a_hat = normalize_adjacency(adj)

    features = jax.random.normal(kf, (N, IN_FEATS), jnp.float32)
    params = init_gcn_params(kp, IN_FEATS, N_HIDDEN, N_CLASSES, N_LAYERS)

    out = gcn_forward(a_hat, features, params)
    jax.block_until_ready(out)

    assert out.shape == (N, N_CLASSES), out.shape

    # Correctness check vs pure-JAX f32 reference (loose tolerance: bf16 operands).
    ref = gcn_reference(a_hat, features, params)
    max_err = float(jnp.max(jnp.abs(out - ref)))
    assert max_err < 0.1, f"max abs error {max_err}"

    print("KERNEL_OK")
</pallas_src>

<mosaic_0001>
module attributes {stable_mosaic.version = 11 : i64} {
  func.func @gcn_fused_kernel(%arg0: memref<128x128xbf16, #tpu.memory_space<vmem>>, %arg1: memref<128x128xbf16, #tpu.memory_space<vmem>>, %arg2: memref<2x128x128xbf16, #tpu.memory_space<vmem>>, %arg3: memref<2x1x128xf32, #tpu.memory_space<vmem>>, %arg4: memref<128x128xf32, #tpu.memory_space<vmem>>) attributes {dimension_semantics = [], scalar_prefetch = 0 : i64, scratch_operands = 0 : i64, tpu.core_type = #tpu.core_type<tc>} {
    %c0 = arith.constant 0 : index
    %c0_0 = arith.constant 0 : index
    %0 = vector.load %arg0[%c0, %c0_0] : memref<128x128xbf16, #tpu.memory_space<vmem>>, vector<128x128xbf16>
    %c0_1 = arith.constant 0 : index
    %c0_2 = arith.constant 0 : index
    %1 = vector.load %arg1[%c0_1, %c0_2] : memref<128x128xbf16, #tpu.memory_space<vmem>>, vector<128x128xbf16>
    %c0_3 = arith.constant 0 : index
    %c0_4 = arith.constant 0 : index
    %c0_5 = arith.constant 0 : index
    %2 = vector.load %arg2[%c0_3, %c0_4, %c0_5] : memref<2x128x128xbf16, #tpu.memory_space<vmem>>, vector<1x128x128xbf16>
    %3 = vector.shape_cast %2 : vector<1x128x128xbf16> to vector<128x128xbf16>
    %c0_6 = arith.constant 0 : index
    %c0_7 = arith.constant 0 : index
    %c0_8 = arith.constant 0 : index
    %4 = vector.load %arg3[%c0_6, %c0_7, %c0_8] : memref<2x1x128xf32, #tpu.memory_space<vmem>>, vector<1x1x128xf32>
    %5 = vector.shape_cast %4 : vector<1x1x128xf32> to vector<1x128xf32>
    %cst = arith.constant dense<0.000000e+00> : vector<128x128xf32>
    %6 = tpu.matmul %0, %1, %cst {dimension_numbers = #tpu.dot_dimension_numbers<[1], [0], [0], [1], [0, 0, 1, 1], [], []>} : vector<128x128xbf16>, vector<128x128xbf16>, vector<128x128xf32> -> vector<128x128xf32>
    %7 = arith.truncf %6 : vector<128x128xf32> to vector<128x128xbf16>
    %cst_9 = arith.constant dense<0.000000e+00> : vector<128x128xf32>
    %8 = tpu.matmul %7, %3, %cst_9 {dimension_numbers = #tpu.dot_dimension_numbers<[1], [0], [0], [1], [0, 0, 1, 1], [], []>} : vector<128x128xbf16>, vector<128x128xbf16>, vector<128x128xf32> -> vector<128x128xf32>
    %9 = vector.broadcast %5 : vector<1x128xf32> to vector<128x128xf32>
    %10 = arith.addf %8, %9 : vector<128x128xf32>
    %cst_10 = arith.constant 0.000000e+00 : f32
    %11 = vector.broadcast %cst_10 : f32 to vector<128x128xf32>
    %12 = arith.maximumf %10, %11 : vector<128x128xf32>
    %13 = arith.truncf %12 : vector<128x128xf32> to vector<128x128xbf16>
    %c1 = arith.constant 1 : index
    %c0_11 = arith.constant 0 : index
    %c0_12 = arith.constant 0 : index
    %14 = vector.load %arg2[%c1, %c0_11, %c0_12] : memref<2x128x128xbf16, #tpu.memory_space<vmem>>, vector<1x128x128xbf16>
    %15 = vector.shape_cast %14 : vector<1x128x128xbf16> to vector<128x128xbf16>
    %c1_13 = arith.constant 1 : index
    %c0_14 = arith.constant 0 : index
    %c0_15 = arith.constant 0 : index
    %16 = vector.load %arg3[%c1_13, %c0_14, %c0_15] : memref<2x1x128xf32, #tpu.memory_space<vmem>>, vector<1x1x128xf32>
    %17 = vector.shape_cast %16 : vector<1x1x128xf32> to vector<1x128xf32>
    %cst_16 = arith.constant dense<0.000000e+00> : vector<128x128xf32>
    %18 = tpu.matmul %13, %15, %cst_16 {dimension_numbers = #tpu.dot_dimension_numbers<[1], [0], [0], [1], [0, 0, 1, 1], [], []>} : vector<128x128xbf16>, vector<128x128xbf16>, vector<128x128xf32> -> vector<128x128xf32>
    %19 = arith.truncf %18 : vector<128x128xf32> to vector<128x128xbf16>
    %cst_17 = arith.constant dense<0.000000e+00> : vector<128x128xf32>
    %20 = tpu.matmul %0, %19, %cst_17 {dimension_numbers = #tpu.dot_dimension_numbers<[1], [0], [0], [1], [0, 0, 1, 1], [], []>} : vector<128x128xbf16>, vector<128x128xbf16>, vector<128x128xf32> -> vector<128x128xf32>
    %21 = vector.broadcast %17 : vector<1x128xf32> to vector<128x128xf32>
    %22 = arith.addf %20, %21 : vector<128x128xf32>
    %c0_18 = arith.constant 0 : index
    %c0_19 = arith.constant 0 : index
    %23 = vector.load %arg4[%c0_18, %c0_19] : memref<128x128xf32, #tpu.memory_space<vmem>>, vector<128x128xf32>
    tpu.vector_store %arg4[%c0_18, %c0_19], %22 {strides = array<i32>} : memref<128x128xf32, #tpu.memory_space<vmem>>, vector<128x128xf32>,
    return
  }
}

</mosaic_0001>

<bundles_post_ra>
// kernel: tpu_custom_call.1
= control target key start
LH: loop header
LB: loop body
LE: loop exit
PB: predicated region body
PF: predicated region fallthrough
CT: control target
= control target key end

     0   :  { %9 = vsyncpa [#allocation3], 0  ;;  %s959_s0 = inlined_call_operand.hbm [shape: bf16[128,128], index: 0, kind: input, shape index: {}]   ;;  %s960_s1 = inlined_call_operand.hbm [shape: bf16[128,128], index: 1, kind: input, shape index: {}]   ;;  %s961_s2 = inlined_call_operand.hbm [shape: bf16[2,128,128], index: 2, kind: input, shape index: {}]   ;;  %s962_s3 = inlined_call_operand.vmem [shape: f32[2,1,128], index: 3, kind: input, shape index: {}]   ;;  %s963_s4 = inlined_call_operand.hbm [shape: f32[128,128], index: 4, kind: output, shape index: {}]  }
   0x1   :  { %10 = vsyncpa [#allocation6], 0 }
   0x2   :  { %11 = vsyncpa [#allocation4], 0  ;;  %s29_s17 = sshll.u32 %s960_s1, 4  ;;  %s876_s18 = smov [#allocation5]   ;;  %s30_s17 = int_to_ptr.hbm [resolvable:$true] %s29_s17 }
   0x3   :  { %s31_s19 = sshll.u32 %s876_s18, 4  ;;  %s16_s22 = sshll.u32 %s959_s0, 4  ;;  %s32_s19 = int_to_ptr.vmem [resolvable:$true] %s31_s19  ;;  %s17_s22 = int_to_ptr.hbm [resolvable:$true] %s16_s22 }
   0x4   :  { %s877_s23 = smov 64   ;;  %s878_s24 = smov 4  }
   0x5   :  { %37 = dma.hbm_to_vmem [thread:$0]  %s30_s17, 1024, %s32_s19, [#allocation6], %s877_s23, %s877_s23, %s878_s24  }
   0x6   :  { %s879_s25 = smov [#allocation2]   ;;  %s42_s29 = sshll.u32 %s961_s2, 4  ;;  %s43_s29 = int_to_ptr.hbm [resolvable:$true] %s42_s29 }
   0x7   :  { %s18_s26 = sshll.u32 %s879_s25, 4  ;;  %s880_s1 = smov [#allocation7]   ;;  %s19_s26 = int_to_ptr.vmem [resolvable:$true] %s18_s26 }
   0x8   :  { %24 = dma.hbm_to_vmem [thread:$0]  %s17_s22, 1024, %s19_s26, [#allocation3], %s877_s23, %s877_s23, %s878_s24  }
   0x9   :  { %s44_s30 = sshll.u32 %s880_s1, 4  ;;  %s45_s30 = int_to_ptr.vmem [resolvable:$true] %s44_s30 }
   0xa   :  { %50 = dma.hbm_to_vmem [thread:$0]  %s43_s29, 2048, %s45_s30, [#allocation6], %s877_s23, %s877_s23, %s878_s24  }
   0xb   :  { %870 = dma.done.wait [#allocation3], 1024  }
   0xc   :  { %871 = vsyncadd [#allocation3], 4294966272 }
   0xd   :  { %872 = dma.done.wait [#allocation6], 3072  }
   0xe   :  { %873 = vsyncadd [#allocation6], 4294964224  ;;  %v747_v0 = vld [vmem:[#allocation5 + $0x38] sm:$0xff]  ;;  %v746_v1 = vld [vmem:[#allocation5 + $0x30] sm:$0xff]  ;;  %s589_s10 = sshll.u32 %s963_s4, 4  ;;  %s882_s11 = smov 128   ;;  %s590_s10 = int_to_ptr.hbm [resolvable:$true] %s589_s10 }
   0xf   :  { %210 = vmatpush.bf16.msra.mxu0 %v747_v0  ;;  %v745_v2 = vld [vmem:[#allocation5 + $0x28] sm:$0xff]  ;;  %v744_v3 = vld [vmem:[#allocation5 + $0x20] sm:$0xff]  ;;  %v743_v4 = vld [vmem:[#allocation5 + $0x18] sm:$0xff]  ;;  %s883_s12 = smov 8  }
  0x10   :  { %v742_v5 = vld [vmem:[#allocation5 + $0x10] sm:$0xff]  ;;  %v741_v6 = vld [vmem:[#allocation5 + $0x8] sm:$0xff]  ;;  %v740_v7 = vld [vmem:[#allocation5] sm:$0xff] }
  0x11   :  { %v918_v8 = vld [vmem:[#allocation2] sm:$0xff]  ;;  %v921_v9 = vld [vmem:[#allocation2 + $0x8] sm:$0xff]  ;;  %v924_v10 = vld [vmem:[#allocation2 + $0x10] sm:$0xff] }
  0x12   :  { %v927_v11 = vld [vmem:[#allocation2 + $0x18] sm:$0xff]  ;;  %v930_v12 = vld [vmem:[#allocation2 + $0x20] sm:$0xff]  ;;  %v754_v14 = vld [vmem:[#allocation7 + $0x30] sm:$0xff] }
  0x13   :  { %211 = vmatpush.bf16.msra.mxu0 %v746_v1  ;;  %v755_v13 = vld [vmem:[#allocation7 + $0x38] sm:$0xff]  ;;  %v933_v15 = vld [vmem:[#allocation2 + $0x28] sm:$0xff]  ;;  %v752_v17 = vld [vmem:[#allocation7 + $0x20] sm:$0xff] }
  0x14   :  { %318 = vmatpush.bf16.msra.mxu1 %v755_v13  ;;  %v753_v16 = vld [vmem:[#allocation7 + $0x28] sm:$0xff]  ;;  %v751_v18 = vld [vmem:[#allocation7 + $0x18] sm:$0xff]  ;;  %v750_v19 = vld [vmem:[#allocation7 + $0x10] sm:$0xff] }
  0x15   :  { %v936_v20 = vld [vmem:[#allocation2 + $0x30] sm:$0xff]  ;;  %v749_v21 = vld [vmem:[#allocation7 + $0x8] sm:$0xff]  ;;  %v748_v22 = vld [vmem:[#allocation7] sm:$0xff] }
  0x16   :  { %v939_v23 = vld [vmem:[#allocation2 + $0x38] sm:$0xff]  ;;  %v762_v43 = vld [vmem:[#allocation7 + $0x70] sm:$0xff]  ;;  %v761_v44 = vld [vmem:[#allocation7 + $0x68] sm:$0xff] }
  0x17   :  { %212 = vmatpush.bf16.msra.mxu0 %v745_v2  ;;  %v763_v40 = vld [vmem:[#allocation7 + $0x78] sm:$0xff]  ;;  %v760_v46 = vld [vmem:[#allocation7 + $0x60] sm:$0xff]  ;;  %v758_v50 = vld [vmem:[#allocation7 + $0x50] sm:$0xff] }
  0x18   :  { %319 = vmatpush.bf16.msra.mxu1 %v754_v14  ;;  %458 = vmatpush.bf16.msra.mxu2 %v763_v40  ;;  %v759_v47 = vld [vmem:[#allocation7 + $0x58] sm:$0xff]  ;;  %v757_v51 = vld [vmem:[#allocation7 + $0x48] sm:$0xff]  ;;  %v756_v53 = vld [vmem:[#allocation7 + $0x40] sm:$0xff] }
  0x19   :  { %v772_v57 = vld [vmem:[%s962_s3] ss:$0 sm:$0xff] }
  0x1b   :  { %213 = vmatpush.bf16.msra.mxu0 %v744_v3 }
  0x1c   :  { %320 = vmatpush.bf16.msra.mxu1 %v753_v16  ;;  %459 = vmatpush.bf16.msra.mxu2 %v762_v43 }
  0x1f   :  { %214 = vmatpush.bf16.msra.mxu0 %v743_v4 }
  0x20   :  { %321 = vmatpush.bf16.msra.mxu1 %v752_v17  ;;  %460 = vmatpush.bf16.msra.mxu2 %v761_v44 }
  0x23   :  { %215 = vmatpush.bf16.msra.mxu0 %v742_v5 }
  0x24   :  { %322 = vmatpush.bf16.msra.mxu1 %v751_v18  ;;  %461 = vmatpush.bf16.msra.mxu2 %v760_v46 }
  0x27   :  { %216 = vmatpush.bf16.msra.mxu0 %v741_v6 }
  0x28   :  { %323 = vmatpush.bf16.msra.mxu1 %v750_v19  ;;  %462 = vmatpush.bf16.msra.mxu2 %v759_v47 }
  0x2b   :  { %217 = vmatpush.bf16.msra.mxu0 %v740_v7 }
  0x2c   :  { %324 = vmatpush.bf16.msra.mxu1 %v749_v21  ;;  %463 = vmatpush.bf16.msra.mxu2 %v758_v50 }
  0x2e   :  { %218 = vmatmul.bf16.vlgmr.msra.gmra.mxu0 %v918_v8 }
  0x30   :  { %325 = vmatpush.bf16.msra.mxu1 %v748_v22  ;;  %464 = vmatpush.bf16.msra.mxu2 %v757_v51 }
  0x34   :  { %465 = vmatpush.bf16.msra.mxu2 %v756_v53 }
  0x3e   :  { %223 = vmatmul.bf16.gmra.mxu0 %v921_v9 }
  0x4e   :  { %228 = vmatmul.bf16.gmra.mxu0 %v924_v10 }
  0x5e   :  { %233 = vmatmul.bf16.gmra.mxu0 %v927_v11 }
  0x6e   :  { %238 = vmatmul.bf16.gmra.mxu0 %v930_v12 }
  0x7e   :  { %243 = vmatmul.bf16.gmra.mxu0 %v933_v15 }
  0x8e   :  { %248 = vmatmul.bf16.gmra.mxu0 %v936_v20 }
  0x9e   :  { %253 = vmatmul.bf16.gmra.mxu0 %v939_v23 }
  0xab   :  { %v219_v24 = vpop.f32.mrf.mxu0 }
  0xb3   :  { %v221_v25 = vpop.f32.mrf.mxu0 }
  0xb4   :  { %v259_v26 = vpack.c.bf16 %v221_v25, %v219_v24 }
  0xb6   :  { %326 = vmatmul.bf16.vlgmr.msra.gmra.mxu1 %v259_v26 }
  0xbb   :  { %v224_v27 = vpop.f32.mrf.mxu0 }
  0xc3   :  { %v226_v28 = vpop.f32.mrf.mxu0 }
  0xc4   :  { %v260_v29 = vpack.c.bf16 %v226_v28, %v224_v27 }
  0xc6   :  { %331 = vmatmul.bf16.gmra.mxu1 %v260_v29 }
  0xcb   :  { %v229_v30 = vpop.f32.mrf.mxu0 }
  0xd3   :  { %v231_v31 = vpop.f32.mrf.mxu0 }
  0xd4   :  { %v261_v32 = vpack.c.bf16 %v231_v31, %v229_v30 }
  0xd6   :  { %336 = vmatmul.bf16.gmra.mxu1 %v261_v32 }
  0xdb   :  { %v234_v33 = vpop.f32.mrf.mxu0 }
  0xe3   :  { %v236_v34 = vpop.f32.mrf.mxu0 }
  0xe4   :  { %v262_v35 = vpack.c.bf16 %v236_v34, %v234_v33 }
  0xe6   :  { %341 = vmatmul.bf16.gmra.mxu1 %v262_v35 }
  0xeb   :  { %v239_v36 = vpop.f32.mrf.mxu0 }
  0xf3   :  { %v241_v37 = vpop.f32.mrf.mxu0 }
  0xf4   :  { %v263_v38 = vpack.c.bf16 %v241_v37, %v239_v36 }
  0xf6   :  { %346 = vmatmul.bf16.gmra.mxu1 %v263_v38 }
  0xfb   :  { %v244_v39 = vpop.f32.mrf.mxu0 }
 0x103   :  { %v246_v41 = vpop.f32.mrf.mxu0 }
 0x104   :  { %v264_v42 = vpack.c.bf16 %v246_v41, %v244_v39 }
 0x106   :  { %351 = vmatmul.bf16.gmra.mxu1 %v264_v42 }
 0x10b   :  { %v249_v45 = vpop.f32.mrf.mxu0 }
 0x113   :  { %v251_v48 = vpop.f32.mrf.mxu0 }
 0x114   :  { %v265_v49 = vpack.c.bf16 %v251_v48, %v249_v45 }
 0x116   :  { %356 = vmatmul.bf16.gmra.mxu1 %v265_v49 }
 0x11b   :  { %v254_v52 = vpop.f32.mrf.mxu0 }
 0x123   :  { %v256_v54 = vpop.f32.mrf.mxu0 }
 0x124   :  { %v266_v55 = vpack.c.bf16 %v256_v54, %v254_v52 }
 0x126   :  { %361 = vmatmul.bf16.gmra.mxu1 %v266_v55 }
 0x133   :  { %v327_v56 = vpop.f32.mrf.mxu1 }
 0x134   :  { %v328_v58 = vadd.f32 %v772_v57, %v327_v56 }
 0x136   :  { %v367_v61 = vmax.f32 %v328_v58, 0.0 }
 0x13b   :  { %v329_v59 = vpop.f32.mrf.mxu1 }
 0x13c   :  { %v330_v60 = vadd.f32 %v772_v57, %v329_v59 }
 0x13e   :  { %v368_v62 = vmax.f32 %v330_v60, 0.0 }
 0x140   :  { %v383_v63 = vpack.c.bf16 %v368_v62, %v367_v61 }
 0x142   :  { %466 = vmatmul.bf16.vlgmr.msra.gmra.mxu2 %v383_v63 }
 0x143   :  { %v332_v0 = vpop.f32.mrf.mxu1 }
 0x144   :  { %v333_v1 = vadd.f32 %v772_v57, %v332_v0 }
 0x146   :  { %v369_v4 = vmax.f32 %v333_v1, 0.0 }
 0x14b   :  { %v334_v2 = vpop.f32.mrf.mxu1 }
 0x14c   :  { %v335_v3 = vadd.f32 %v772_v57, %v334_v2 }
 0x14e   :  { %v370_v5 = vmax.f32 %v335_v3, 0.0 }
 0x150   :  { %v384_v6 = vpack.c.bf16 %v370_v5, %v369_v4 }
 0x152   :  { %471 = vmatmul.bf16.gmra.mxu2 %v384_v6 }
 0x153   :  { %v337_v7 = vpop.f32.mrf.mxu1 }
 0x154   :  { %v338_v13 = vadd.f32 %v772_v57, %v337_v7 }
 0x156   :  { %v371_v17 = vmax.f32 %v338_v13, 0.0 }
 0x15b   :  { %v339_v14 = vpop.f32.mrf.mxu1 }
 0x15c   :  { %v340_v16 = vadd.f32 %v772_v57, %v339_v14 }
 0x15e   :  { %v372_v18 = vmax.f32 %v340_v16, 0.0 }
 0x160   :  { %v385_v19 = vpack.c.bf16 %v372_v18, %v371_v17 }
 0x162   :  { %476 = vmatmul.bf16.gmra.mxu2 %v385_v19 }
 0x163   :  { %v342_v21 = vpop.f32.mrf.mxu1 }
 0x164   :  { %v343_v22 = vadd.f32 %v772_v57, %v342_v21 }
 0x166   :  { %v373_v26 = vmax.f32 %v343_v22, 0.0 }
 0x16b   :  { %v344_v24 = vpop.f32.mrf.mxu1 }
 0x16c   :  { %v345_v25 = vadd.f32 %v772_v57, %v344_v24 }
 0x16e   :  { %v374_v27 = vmax.f32 %v345_v25, 0.0  ;;  %v773_v25 = vld [vmem:[%s962_s3 + $0x1] ss:$0 sm:$0xff]  ;;  %s881_s3 = smov [#allocation8]  }
 0x16f   :  { %s587_s7 = sshll.u32 %s881_s3, 4  ;;  %s588_s7 = int_to_ptr.vmem [resolvable:$true] %s587_s7 }
 0x170   :  { %v386_v28 = vpack.c.bf16 %v374_v27, %v373_v26 }
 0x172   :  { %481 = vmatmul.bf16.gmra.mxu2 %v386_v28 }
 0x173   :  { %v347_v29 = vpop.f32.mrf.mxu1 }
 0x174   :  { %v348_v30 = vadd.f32 %v772_v57, %v347_v29 }
 0x176   :  { %v375_v33 = vmax.f32 %v348_v30, 0.0 }
 0x17b   :  { %v349_v31 = vpop.f32.mrf.mxu1 }
 0x17c   :  { %v350_v32 = vadd.f32 %v772_v57, %v349_v31 }
 0x17e   :  { %v376_v34 = vmax.f32 %v350_v32, 0.0 }
 0x180   :  { %v387_v35 = vpack.c.bf16 %v376_v34, %v375_v33 }
 0x182   :  { %486 = vmatmul.bf16.gmra.mxu2 %v387_v35 }
 0x183   :  { %v352_v36 = vpop.f32.mrf.mxu1 }
 0x184   :  { %v353_v37 = vadd.f32 %v772_v57, %v352_v36 }
 0x186   :  { %v377_v40 = vmax.f32 %v353_v37, 0.0 }
 0x18b   :  { %v354_v38 = vpop.f32.mrf.mxu1 }
 0x18c   :  { %v355_v39 = vadd.f32 %v772_v57, %v354_v38 }
 0x18e   :  { %v378_v41 = vmax.f32 %v355_v39, 0.0 }
 0x190   :  { %v388_v42 = vpack.c.bf16 %v378_v41, %v377_v40 }
 0x192   :  { %491 = vmatmul.bf16.gmra.mxu2 %v388_v42 }
 0x193   :  { %v357_v43 = vpop.f32.mrf.mxu1 }
 0x194   :  { %v358_v44 = vadd.f32 %v772_v57, %v357_v43 }
 0x196   :  { %v379_v47 = vmax.f32 %v358_v44, 0.0 }
 0x19b   :  { %v359_v45 = vpop.f32.mrf.mxu1 }
 0x19c   :  { %v360_v46 = vadd.f32 %v772_v57, %v359_v45 }
 0x19e   :  { %v380_v48 = vmax.f32 %v360_v46, 0.0 }
 0x1a0   :  { %v389_v49 = vpack.c.bf16 %v380_v48, %v379_v47 }
 0x1a2   :  { %496 = vmatmul.bf16.gmra.mxu2 %v389_v49 }
 0x1a3   :  { %v362_v50 = vpop.f32.mrf.mxu1 }
 0x1a4   :  { %v363_v51 = vadd.f32 %v772_v57, %v362_v50 }
 0x1a6   :  { %v381_v54 = vmax.f32 %v363_v51, 0.0 }
 0x1ab   :  { %v364_v52 = vpop.f32.mrf.mxu1 }
 0x1ac   :  { %v365_v53 = vadd.f32 %v772_v57, %v364_v52 }
 0x1ae   :  { %v382_v55 = vmax.f32 %v365_v53, 0.0 }
 0x1b0   :  { %v390_v56 = vpack.c.bf16 %v382_v55, %v381_v54 }
 0x1b2   :  { %501 = vmatmul.bf16.gmra.mxu2 %v390_v56 }
 0x1c5   :  { %v467_v58 = vpop.f32.mrf.mxu2 }
 0x1cd   :  { %v469_v59 = vpop.f32.mrf.mxu2 }
 0x1ce   :  { %v507_v60 = vpack.c.bf16 %v469_v59, %v467_v58 }
 0x1d5   :  { %v472_v61 = vpop.f32.mrf.mxu2 }
 0x1dd   :  { %v474_v62 = vpop.f32.mrf.mxu2 }
 0x1de   :  { %v508_v63 = vpack.c.bf16 %v474_v62, %v472_v61 }
 0x1e5   :  { %v477_v0 = vpop.f32.mrf.mxu2 }
 0x1ed   :  { %v479_v1 = vpop.f32.mrf.mxu2 }
 0x1ee   :  { %v509_v2 = vpack.c.bf16 %v479_v1, %v477_v0 }
 0x1f5   :  { %v482_v3 = vpop.f32.mrf.mxu2 }
 0x1fd   :  { %v484_v4 = vpop.f32.mrf.mxu2 }
 0x1fe   :  { %v510_v5 = vpack.c.bf16 %v484_v4, %v482_v3 }
 0x205   :  { %v487_v6 = vpop.f32.mrf.mxu2 }
 0x20d   :  { %v489_v7 = vpop.f32.mrf.mxu2 }
 0x20e   :  { %v511_v24 = vpack.c.bf16 %v489_v7, %v487_v6 }
 0x215   :  { %v492_v13 = vpop.f32.mrf.mxu2 }
 0x21d   :  { %v494_v57 = vpop.f32.mrf.mxu2 }
 0x21e   :  { %v512_v22 = vpack.c.bf16 %v494_v57, %v492_v13 }
 0x225   :  { %v497_v14 = vpop.f32.mrf.mxu2 }
 0x22d   :  { %v499_v16 = vpop.f32.mrf.mxu2 }
 0x22e   :  { %v513_v21 = vpack.c.bf16 %v499_v16, %v497_v14 }
 0x235   :  { %v502_v17 = vpop.f32.mrf.mxu2 }
 0x23d   :  { %v504_v18 = vpop.f32.mrf.mxu2 }
 0x23e   :  { %v514_v19 = vpack.c.bf16 %v504_v18, %v502_v17 }
 0x240   :  { %518 = vmatpush.bf16.msra.mxu3 %v514_v19 }
 0x244   :  { %519 = vmatpush.bf16.msra.mxu3 %v513_v21 }
 0x248   :  { %520 = vmatpush.bf16.msra.mxu3 %v512_v22 }
 0x24c   :  { %521 = vmatpush.bf16.msra.mxu3 %v511_v24 }
 0x250   :  { %522 = vmatpush.bf16.msra.mxu3 %v510_v5 }
 0x254   :  { %523 = vmatpush.bf16.msra.mxu3 %v509_v2 }
 0x258   :  { %524 = vmatpush.bf16.msra.mxu3 %v508_v63 }
 0x25c   :  { %525 = vmatpush.bf16.msra.mxu3 %v507_v60 }
 0x25f   :  { %526 = vmatmul.bf16.vlgmr.msra.gmra.mxu3 %v918_v8 }
 0x26f   :  { %531 = vmatmul.bf16.gmra.mxu3 %v921_v9 }
 0x27f   :  { %536 = vmatmul.bf16.gmra.mxu3 %v924_v10 }
 0x28f   :  { %541 = vmatmul.bf16.gmra.mxu3 %v927_v11 }
 0x29f   :  { %546 = vmatmul.bf16.gmra.mxu3 %v930_v12 }
 0x2af   :  { %551 = vmatmul.bf16.gmra.mxu3 %v933_v15 }
 0x2bf   :  { %556 = vmatmul.bf16.gmra.mxu3 %v936_v20 }
 0x2cf   :  { %561 = vmatmul.bf16.gmra.mxu3 %v939_v23 }
 0x2e2   :  { %v527_v26 = vpop.f32.mrf.mxu3 }
 0x2e3   :  { %v528_v8 = vadd.f32 %v773_v25, %v527_v26 }
 0x2e5   :  { %567 = vst [vmem:[#allocation8] sm:$0xff] %v528_v8 }
 0x2ea   :  { %v529_v9 = vpop.f32.mrf.mxu3 }
 0x2eb   :  { %v530_v27 = vadd.f32 %v773_v25, %v529_v9 }
 0x2ed   :  { %568 = vst [vmem:[#allocation8 + $0x8] sm:$0xff] %v530_v27 }
 0x2f2   :  { %v532_v10 = vpop.f32.mrf.mxu3 }
 0x2f3   :  { %v533_v11 = vadd.f32 %v773_v25, %v532_v10 }
 0x2f5   :  { %569 = vst [vmem:[#allocation8 + $0x10] sm:$0xff] %v533_v11 }
 0x2fa   :  { %v534_v12 = vpop.f32.mrf.mxu3 }
 0x2fb   :  { %v535_v28 = vadd.f32 %v773_v25, %v534_v12 }
 0x2fd   :  { %570 = vst [vmem:[#allocation8 + $0x18] sm:$0xff] %v535_v28 }
 0x302   :  { %v537_v15 = vpop.f32.mrf.mxu3 }
 0x303   :  { %v538_v20 = vadd.f32 %v773_v25, %v537_v15 }
 0x305   :  { %571 = vst [vmem:[#allocation8 + $0x20] sm:$0xff] %v538_v20 }
 0x30a   :  { %v539_v23 = vpop.f32.mrf.mxu3 }
 0x30b   :  { %v540_v29 = vadd.f32 %v773_v25, %v539_v23 }
 0x30d   :  { %572 = vst [vmem:[#allocation8 + $0x28] sm:$0xff] %v540_v29 }
 0x312   :  { %v542_v30 = vpop.f32.mrf.mxu3 }
 0x313   :  { %v543_v31 = vadd.f32 %v773_v25, %v542_v30 }
 0x315   :  { %573 = vst [vmem:[#allocation8 + $0x30] sm:$0xff] %v543_v31 }
 0x31a   :  { %v544_v32 = vpop.f32.mrf.mxu3 }
 0x31b   :  { %v545_v33 = vadd.f32 %v773_v25, %v544_v32 }
 0x31d   :  { %574 = vst [vmem:[#allocation8 + $0x38] sm:$0xff] %v545_v33 }
 0x322   :  { %v547_v34 = vpop.f32.mrf.mxu3 }
 0x323   :  { %v548_v35 = vadd.f32 %v773_v25, %v547_v34 }
 0x325   :  { %575 = vst [vmem:[#allocation8 + $0x40] sm:$0xff] %v548_v35 }
 0x32a   :  { %v549_v36 = vpop.f32.mrf.mxu3 }
 0x32b   :  { %v550_v37 = vadd.f32 %v773_v25, %v549_v36 }
 0x32d   :  { %576 = vst [vmem:[#allocation8 + $0x48] sm:$0xff] %v550_v37 }
 0x332   :  { %v552_v38 = vpop.f32.mrf.mxu3 }
 0x333   :  { %v553_v39 = vadd.f32 %v773_v25, %v552_v38 }
 0x335   :  { %577 = vst [vmem:[#allocation8 + $0x50] sm:$0xff] %v553_v39 }
 0x33a   :  { %v554_v40 = vpop.f32.mrf.mxu3 }
 0x33b   :  { %v555_v41 = vadd.f32 %v773_v25, %v554_v40 }
 0x33d   :  { %578 = vst [vmem:[#allocation8 + $0x58] sm:$0xff] %v555_v41 }
 0x342   :  { %v557_v42 = vpop.f32.mrf.mxu3 }
 0x343   :  { %v558_v43 = vadd.f32 %v773_v25, %v557_v42 }
 0x345   :  { %579 = vst [vmem:[#allocation8 + $0x60] sm:$0xff] %v558_v43 }
 0x34a   :  { %v559_v44 = vpop.f32.mrf.mxu3 }
 0x34b   :  { %v560_v45 = vadd.f32 %v773_v25, %v559_v44 }
 0x34d   :  { %580 = vst [vmem:[#allocation8 + $0x68] sm:$0xff] %v560_v45 }
 0x352   :  { %v562_v46 = vpop.f32.mrf.mxu3 }
 0x353   :  { %v563_v47 = vadd.f32 %v773_v25, %v562_v46 }
 0x355   :  { %581 = vst [vmem:[#allocation8 + $0x70] sm:$0xff] %v563_v47 }
 0x35a   :  { %v564_v48 = vpop.f32.mrf.mxu3 }
 0x35b   :  { %v565_v49 = vadd.f32 %v773_v25, %v564_v48 }
 0x35d   :  { %582 = vst [vmem:[#allocation8 + $0x78] sm:$0xff] %v565_v49 }
 0x35e   :  { %595 = dma.vmem_to_hbm [thread:$0]  %s588_s7, 2048, %s590_s10, [#allocation4], %s882_s11, %s882_s11, %s883_s12  }
 0x35f   :  { %874 = dma.done.wait [#allocation4], 2048  }
 0x360   :  { %875 = vsyncadd [#allocation4], 4294965248 }
 0x361   :  { %600 = vsyncpa [#allocation3], 1 }
 0x362   :  { %601 = vsyncpa [#allocation6], 1 }
 0x363   :  { %602 = vsyncpa [#allocation4], 1 }

</bundles_post_ra>
